<compile_context>
chip_gen: v6e
topology: v6e:2x2x1
jax: 0.10.0
libtpu: 0.0.40
codegen_flags: <defaults>
</compile_context>

<pallas_src>
import jax
import jax.numpy as jnp
import numpy as np
from jax.experimental import pallas as pl
from jax.experimental.pallas import tpu as pltpu


def _copy_kernel(x_ref, o_ref):
    # Pure copy of the current (tn, tf) lane-dense block.
    o_ref[...] = x_ref[...]


def _sublane_multiple(dtype):
    itemsize = jnp.dtype(dtype).itemsize
    if itemsize >= 4:
        return 8
    if itemsize == 2:
        return 16
    return 32


def _round_down(value, multiple):
    return max(multiple, (value // multiple) * multiple)


def identical_pool(x, batch=None, *, target_tile_bytes=4 * 2**20):
    """Pallas equivalent of IdenticalPool.forward(x, batch) -> x.

    `batch` is accepted for signature parity with the PyTorch module but is
    ignored (the reference forward returns x unchanged).
    """
    del batch  # forward() returns x unchanged
    if x.ndim == 0 or x.size == 0:
        return x

    orig_shape = x.shape
    dtype = x.dtype
    itemsize = jnp.dtype(dtype).itemsize
    total = int(np.prod(orig_shape))
    sub = _sublane_multiple(dtype)

    # Clamp the per-tile budget so 2x-input + 2x-output double buffers stay
    # well under v7x's 64 MiB VMEM (<= ~32 MiB of buffers).
    target_tile_bytes = int(min(max(target_tile_bytes, 128 * 1024), 8 * 2**20))

    # ---- choose a lane-dense 2-D view (rows, lanes) -------------------------
    if total % 128 == 0:
        # Flatten to a wide slab: largest lane width (multiple of 128) dividing
        # `total`, capped so (a) one sublane-group of rows fits the tile budget
        # and (b) there are >= 2*sub rows when possible, giving >= 2 grid steps
        # (keeps both v7x TensorCores streaming).
        lane_cap = max(128, (target_tile_bytes // (sub * itemsize)) // 128 * 128)
        lane_cap = min(lane_cap, 32768)
        if total >= 2 * sub * 128:
            lane_cap = min(lane_cap, max(128, (total // (2 * sub)) // 128 * 128))
        lanes = 128
        cand = 128
        while cand <= lane_cap:
            if total % cand == 0:
                lanes = cand
            cand += 128
        rows = total // lanes
    else:
        # Fallback: collapse leading dims; Pallas masks the ragged lane tail.
        lanes = int(orig_shape[-1])
        rows = total // lanes

    x2d = x.reshape(rows, lanes)  # contiguous row-major -> metadata-only

    # ---- tile selection ------------------------------------------------------
    max_lane_tile = max(128, (target_tile_bytes // (sub * itemsize)) // 128 * 128)
    tf = lanes if lanes <= max_lane_tile else max_lane_tile

    row_budget = max(1, target_tile_bytes // (tf * itemsize))
    if rows <= row_budget:
        tn = rows
    else:
        tn = _round_down(min(row_budget, rows), sub)
    tn = min(tn, rows)

    # Guarantee >= 2 parallel grid steps when the data allows (v7x dual TC).
    if pl.cdiv(rows, tn) * pl.cdiv(lanes, tf) == 1 and rows >= 2 * sub:
        tn = _round_down(rows // 2, sub)

    grid = (pl.cdiv(rows, tn), pl.cdiv(lanes, tf))

    # VMEM: 2 double-buffered input tiles + 2 output tiles + slack, derived
    # from the actual requirement (never clamped below it).
    tile_bytes = tn * tf * itemsize
    needed = 4 * tile_bytes
    vmem_limit = int(max(needed + (2 << 20), 16 << 20))

    cost = pl.CostEstimate(
        flops=0,
        transcendentals=0,
        bytes_accessed=2 * total * itemsize,  # read x + write out
    )

    out2d = pl.pallas_call(
        _copy_kernel,
        out_shape=jax.ShapeDtypeStruct((rows, lanes), dtype),
        grid=grid,
        in_specs=[pl.BlockSpec((tn, tf), lambda i, j: (i, j))],
        out_specs=pl.BlockSpec((tn, tf), lambda i, j: (i, j)),
        input_output_aliases={0: 0},  # donate x -> out; XLA can in-place the copy
        compiler_params=pltpu.CompilerParams(
            dimension_semantics=("parallel", "parallel"),
            vmem_limit_bytes=vmem_limit,
        ),
        cost_estimate=cost,
    )(x2d)

    return out2d.reshape(orig_shape)


if __name__ == "__main__":
    key = jax.random.PRNGKey(0)
    kx, kperm = jax.random.split(key)

    num_nodes = 256   # N
    num_feats = 128   # F
    num_graphs = 4    # B (only used to build the ignored `batch` argument)

    x = jax.random.normal(kx, (num_nodes, num_feats), dtype=jnp.float32)
    batch = jax.random.permutation(
        kperm,
        jnp.repeat(jnp.arange(num_graphs, dtype=jnp.int32),
                   num_nodes // num_graphs))

    # Snapshot the expected result before the (buffer-aliased) kernel runs.
    expected = np.asarray(x).copy()

    out = jax.jit(identical_pool)(x, batch)
    out = jax.block_until_ready(out)

    # Reference: IdenticalPool.forward(x, batch) == x
    if not np.array_equal(np.asarray(out), expected):
        raise AssertionError("Pallas IdenticalPool mismatch vs reference")

    print("KERNEL_OK")
</pallas_src>

<mosaic_0001>
module attributes {stable_mosaic.version = 11 : i64} {
  func.func @_copy_kernel(%arg0: i32, %arg1: i32, %arg2: memref<8x2048xf32, #tpu.memory_space<vmem>>, %arg3: memref<8x2048xf32, #tpu.memory_space<vmem>>) attributes {dimension_semantics = [#tpu.dimension_semantics<parallel>, #tpu.dimension_semantics<parallel>], iteration_bounds = array<i64: 2, 1>, scalar_prefetch = 0 : i64, scratch_operands = 0 : i64, tpu.core_type = #tpu.core_type<tc>, window_params = [{transform_indices = @transform_0, window_bounds = array<i64: 8, 2048>}, {transform_indices = @transform_1, window_bounds = array<i64: 8, 2048>}]} {
    %c0 = arith.constant 0 : index
    %c0_0 = arith.constant 0 : index
    %0 = vector.load %arg2[%c0, %c0_0] : memref<8x2048xf32, #tpu.memory_space<vmem>>, vector<8x2048xf32>
    %c0_1 = arith.constant 0 : index
    %c0_2 = arith.constant 0 : index
    %1 = vector.load %arg3[%c0_1, %c0_2] : memref<8x2048xf32, #tpu.memory_space<vmem>>, vector<8x2048xf32>
    tpu.vector_store %arg3[%c0_1, %c0_2], %0 {strides = array<i32>} : memref<8x2048xf32, #tpu.memory_space<vmem>>, vector<8x2048xf32>,
    return
  }
  func.func @transform_0(%arg0: i32, %arg1: i32) -> (i32, i32) {
    %c0_i32 = arith.constant 0 : i32
    return %arg0, %arg1 : i32, i32
  }
  func.func @transform_1(%arg0: i32, %arg1: i32) -> (i32, i32) {
    %c0_i32 = arith.constant 0 : i32
    return %arg0, %arg1 : i32, i32
  }
}

</mosaic_0001>

<bundles_post_ra>
// kernel: identical_pool.1
= control target key start
LH: loop header
LB: loop body
LE: loop exit
PB: predicated region body
PF: predicated region fallthrough
CT: control target
= control target key end

     0   :  { %s346_s6 = smov 0   ;;  %s348_s7 = smov 0   ;;  %s379_s0 = inlined_call_operand.vmem [shape: f32[16,2048], index: 0, kind: input, shape index: {}, may-alias: {0,1}]   ;;  %s380_s1 = inlined_call_operand.vmem [shape: f32[16,2048], index: 1, kind: output, shape index: {}, may-alias: {0,1}]  }
   0x1   :  { %s350_s8 = smov 0  }
   0x2 LB: > { %s23_s9 = sadd.s32 1, %s330_s7  ;;  %p279_p0 = scmp.ge.s32.totalorder %s334_s8, 1  ;;  %s334_s8 = sphi %s350_s8, %s11_s8   ;;  %s330_s7 = sphi %s348_s7, %s382_s7   ;;  %s326_s6 = sphi %s346_s6, %s381_s6  }
   0x3   : > { %p25_p1 = scmp.ge.s32.totalorder %s23_s9, 2  ;;  %p108_p2 = scmp.lt.s32.totalorder %s334_s8, 3 }
   0x5   : > { %s384_s9 = smov (%p25_p1, %s23_s9), 0  ;;  %p109_p3 = pnand %p279_p0, %p108_p2 }
   0x6   : > { %p137_p4 = scmp.lt.s32.totalorder (!%p109_p3), %s326_s6, 1 }
   0x7   : > { %112 = sbr.rel (%p109_p3) target bundleno = 29 (0x1d), region = 24 }
   0xc   : > { %s386_s6 = smov (!%p137_p4, %s326_s6), 1 }
   0xd   : > { %s286_s10 = sshll.u32 %s386_s6, 7 }
   0xe   : > { %s144_s13 = scalar_lea.vmem %s379_s0, %s286_s10  ;;  %s154_s16 = scalar_lea.vmem %s380_s1, %s286_s10 }
   0xf   : > { %v156_v0 = vld [vmem:[%s144_s13] sm:$0xff]  ;;  %v157_v1 = vld [vmem:[%s144_s13 + $0x8] sm:$0xff]  ;;  %v158_v2 = vld [vmem:[%s144_s13 + $0x10] sm:$0xff] }
  0x10   : > { %v159_v3 = vld [vmem:[%s144_s13 + $0x18] sm:$0xff]  ;;  %v160_v4 = vld [vmem:[%s144_s13 + $0x20] sm:$0xff]  ;;  %v161_v5 = vld [vmem:[%s144_s13 + $0x28] sm:$0xff] }
  0x11   : > { %v162_v6 = vld [vmem:[%s144_s13 + $0x30] sm:$0xff]  ;;  %v163_v7 = vld [vmem:[%s144_s13 + $0x38] sm:$0xff]  ;;  %v164_v8 = vld [vmem:[%s144_s13 + $0x40] sm:$0xff] }
  0x12   : > { %v165_v9 = vld [vmem:[%s144_s13 + $0x48] sm:$0xff]  ;;  %v166_v10 = vld [vmem:[%s144_s13 + $0x50] sm:$0xff]  ;;  %v167_v11 = vld [vmem:[%s144_s13 + $0x58] sm:$0xff] }
  0x13   : > { %v168_v12 = vld [vmem:[%s144_s13 + $0x60] sm:$0xff]  ;;  %v169_v13 = vld [vmem:[%s144_s13 + $0x68] sm:$0xff]  ;;  %v170_v14 = vld [vmem:[%s144_s13 + $0x70] sm:$0xff] }
  0x14   : > { %v171_v15 = vld [vmem:[%s144_s13 + $0x78] sm:$0xff] }
  0x15   : > { %172 = vst [vmem:[%s154_s16] sm:$0xff] %v156_v0  ;;  %173 = vst [vmem:[%s154_s16 + $0x8] sm:$0xff] %v157_v1 }
  0x16   : > { %174 = vst [vmem:[%s154_s16 + $0x10] sm:$0xff] %v158_v2  ;;  %175 = vst [vmem:[%s154_s16 + $0x18] sm:$0xff] %v159_v3 }
  0x17   : > { %176 = vst [vmem:[%s154_s16 + $0x20] sm:$0xff] %v160_v4  ;;  %177 = vst [vmem:[%s154_s16 + $0x28] sm:$0xff] %v161_v5 }
  0x18   : > { %178 = vst [vmem:[%s154_s16 + $0x30] sm:$0xff] %v162_v6  ;;  %179 = vst [vmem:[%s154_s16 + $0x38] sm:$0xff] %v163_v7 }
  0x19   : > { %180 = vst [vmem:[%s154_s16 + $0x40] sm:$0xff] %v164_v8  ;;  %181 = vst [vmem:[%s154_s16 + $0x48] sm:$0xff] %v165_v9 }
  0x1a   : > { %182 = vst [vmem:[%s154_s16 + $0x50] sm:$0xff] %v166_v10  ;;  %183 = vst [vmem:[%s154_s16 + $0x58] sm:$0xff] %v167_v11 }
  0x1b   : > { %184 = vst [vmem:[%s154_s16 + $0x60] sm:$0xff] %v168_v12  ;;  %185 = vst [vmem:[%s154_s16 + $0x68] sm:$0xff] %v169_v13 }
  0x1c   : > { %186 = vst [vmem:[%s154_s16 + $0x70] sm:$0xff] %v170_v14  ;;  %187 = vst [vmem:[%s154_s16 + $0x78] sm:$0xff] %v171_v15 }
  0x1d PF: > { %s11_s8 = sadd.s32 1, %s334_s8   ;;  %s381_s6 = smov %s330_s7 }
  0x1e   : > { %p8_p5 = scmp.ge.s32.totalorder %s11_s8, 4   ;;  %s382_s7 = smov %s384_s9 }
  0x20   :  { %10 = sbr.rel (!%p8_p5) target bundleno = 2 (0x2), region = 54 }

</bundles_post_ra>
